<compile_context>
chip_gen: v7x
topology: tpu7x:2x2x1
jax: 0.10.0
libtpu: 0.0.40
codegen_flags: <defaults>
</compile_context>

<pallas_src>
import functools

import jax
import jax.numpy as jnp
from jax.experimental import pallas as pl
from jax.experimental.pallas import tpu as pltpu


# Flip to jnp.bfloat16 for the fast MXU / half-DMA path on v5e/v6e/v7x
# (accumulation stays f32 via preferred_element_type); loosen tolerances if so.
GEMM_DTYPE = jnp.float32

_VMEM_LIMIT = 32 * 1024 * 1024  # ample for these tile sizes on all generations


# ----------------------------------------------------------------------------
# Pallas kernels
# ----------------------------------------------------------------------------

def _conv_bn_act_all_kernel(p_ref, w_ref, s_ref, b_ref,
                            conv_ref, bn_ref, act_ref):
    """One transposed GEMM tile: (Cout,K) x (K,tm) -> (Cout,tm); emits the conv,
    BN-affine and SiLU results (stem/head chains need all three as features).
    M is on the lane axis -> all three stores are lane-dense."""
    y = jnp.dot(w_ref[...], p_ref[...], preferred_element_type=jnp.float32)
    conv_ref[...] = y
    z = y * s_ref[...] + b_ref[...]
    bn_ref[...] = z
    act_ref[...] = z * jax.nn.sigmoid(z)


def _conv_epilogue_kernel(p_ref, w_ref, s_ref, b_ref, o_ref,
                          *, do_affine, do_act):
    """Same transposed GEMM, single output, optional fused affine / SiLU."""
    y = jnp.dot(w_ref[...], p_ref[...], preferred_element_type=jnp.float32)
    if do_affine:
        y = y * s_ref[...] + b_ref[...]
    if do_act:
        y = y * jax.nn.sigmoid(y)
    o_ref[...] = y


def _affine_act_kernel(x_ref, s_ref, b_ref, o_ref, *, do_affine, do_act):
    """Standalone BN-affine / SiLU fallback on channel-major (C, M) tiles."""
    y = x_ref[...]
    if do_affine:
        y = y * s_ref[...] + b_ref[...]
    if do_act:
        y = y * jax.nn.sigmoid(y)
    o_ref[...] = y


# ----------------------------------------------------------------------------
# Wrappers (layout glue + pallas_call setup)
# ----------------------------------------------------------------------------

def _pick_m_tile(m):
    """Single full tile for small M (no grid-step overhead, no pointless
    megacore split); for large M, 128-lane-multiple tiles with >= 2 steps."""
    if m <= 512:
        return m, m
    for t in (512, 256, 128):
        if m % t == 0:
            return t, m
    mp = -(-m // 128) * 128          # generic pad fallback (never hit here)
    return 128, mp


def _im2col_cm(cur_cm, x_shape, kh, kw, stride, padding):
    """Channel-major im2col: (C, N*H*W) activation -> (KH*KW*Cin, M) patches.

    1x1 / stride-1 / pad-0 convs are a pure metadata pass-through (no copy).
    # TODO(synk): for KxK convs, gather the shifted windows inside the kernel
    # (strided DMA from the padded channel-major input, memory_space=pl.ANY)
    # instead of materializing KH*KW slabs in HBM via XLA."""
    n, h, w, cin = x_shape
    oh = (h + 2 * padding - kh) // stride + 1
    ow = (w + 2 * padding - kw) // stride + 1
    m = n * oh * ow
    if kh == 1 and kw == 1 and stride == 1 and padding == 0:
        return cur_cm.reshape(cin, m), (n, oh, ow)
    x = cur_cm.reshape(cin, n, h, w)
    if padding:
        x = jnp.pad(x, ((0, 0), (0, 0),
                        (padding, padding), (padding, padding)))
    slabs = [
        x[:, :, i:i + stride * oh:stride, j:j + stride * ow:stride]
        .reshape(cin, m)
        for i in range(kh) for j in range(kw)
    ]
    return jnp.concatenate(slabs, axis=0), (n, oh, ow)   # K = tap*Cin + c


def fused_conv_bn_act(cur_cm, x_shape, w_oihw, stride, padding, scale, shift,
                      *, emit_intermediate, do_affine=True, do_act=True):
    """conv (+BN affine) (+SiLU) as one pallas_call with a single fused GEMM.

    cur_cm is the channel-major (Cin, N*H*W) activation.  Returns a tuple of
    channel-major (Cout, M) f32 outputs and the output NHWC shape."""
    cout, cin_w, kh, kw = w_oihw.shape
    _, _, _, cin = x_shape
    assert cin == cin_w
    patches, (n, oh, ow) = _im2col_cm(cur_cm, x_shape, kh, kw, stride, padding)
    m = n * oh * ow
    kdim = kh * kw * cin

    # weight ordered (kh, kw, cin) along K to match the patch stacking order
    w_t = jnp.transpose(w_oihw, (0, 2, 3, 1)).reshape(cout, kdim)
    w_t = w_t.astype(GEMM_DTYPE)
    patches = patches.astype(GEMM_DTYPE)
    s2d = scale.reshape(cout, 1).astype(jnp.float32)
    b2d = shift.reshape(cout, 1).astype(jnp.float32)

    tm, mp = _pick_m_tile(m)
    if mp > m:  # generic fallback; never triggers for the shapes used here
        patches = jnp.pad(patches, ((0, 0), (0, mp - m)))

    grid = (mp // tm,)
    in_specs = [
        pl.BlockSpec((kdim, tm), lambda i: (0, i)),     # patches tile
        pl.BlockSpec((cout, kdim), lambda i: (0, 0)),   # weights (resident)
        pl.BlockSpec((cout, 1), lambda i: (0, 0)),      # BN scale
        pl.BlockSpec((cout, 1), lambda i: (0, 0)),      # BN shift
    ]
    out_spec = pl.BlockSpec((cout, tm), lambda i: (0, i))
    cparams = pltpu.CompilerParams(
        dimension_semantics=("parallel",),
        vmem_limit_bytes=_VMEM_LIMIT,
    )
    # TODO(synk): at production channel counts (Cout >= 640, v7x 64 MiB VMEM)
    # add a Cout grid axis here; at Cout <= 32 a full-Cout block is optimal.

    if emit_intermediate:
        outs = pl.pallas_call(
            _conv_bn_act_all_kernel,
            out_shape=tuple(jax.ShapeDtypeStruct((cout, mp), jnp.float32)
                            for _ in range(3)),
            grid=grid,
            in_specs=in_specs,
            out_specs=(out_spec, out_spec, out_spec),
            compiler_params=cparams,
        )(patches, w_t, s2d, b2d)
    else:
        kernel = functools.partial(_conv_epilogue_kernel,
                                   do_affine=do_affine, do_act=do_act)
        out = pl.pallas_call(
            kernel,
            out_shape=jax.ShapeDtypeStruct((cout, mp), jnp.float32),
            grid=grid,
            in_specs=in_specs,
            out_specs=out_spec,
            compiler_params=cparams,
        )(patches, w_t, s2d, b2d)
        outs = (out,)

    if mp > m:
        outs = tuple(o[:, :m] for o in outs)
    return outs, (n, oh, ow, cout)


def pallas_affine_act(x_cm, scale, shift, *, do_affine, do_act):
    """Standalone BN-affine / SiLU fallback (not hit by this backend's module
    order).  Channel-major layout keeps the long M axis on the lanes."""
    c, m = x_cm.shape
    if do_affine:
        s = scale.reshape(c, 1).astype(jnp.float32)
        b = shift.reshape(c, 1).astype(jnp.float32)
    else:
        s = jnp.ones((c, 1), jnp.float32)
        b = jnp.zeros((c, 1), jnp.float32)

    tm, mp = _pick_m_tile(m)
    xr = x_cm if mp == m else jnp.pad(x_cm, ((0, 0), (0, mp - m)))

    out = pl.pallas_call(
        functools.partial(_affine_act_kernel, do_affine=do_affine, do_act=do_act),
        out_shape=jax.ShapeDtypeStruct((c, mp), jnp.float32),
        grid=(mp // tm,),
        in_specs=[pl.BlockSpec((c, tm), lambda i: (0, i)),
                  pl.BlockSpec((c, 1), lambda i: (0, 0)),
                  pl.BlockSpec((c, 1), lambda i: (0, 0))],
        out_specs=pl.BlockSpec((c, tm), lambda i: (0, i)),
        compiler_params=pltpu.CompilerParams(
            dimension_semantics=("parallel",),
            vmem_limit_bytes=_VMEM_LIMIT),
    )(xr, s, b)
    return out[:, :m] if mp > m else out


# ----------------------------------------------------------------------------
# Encoder forward (feature-collecting loop, same semantics as the PyTorch spec)
# ----------------------------------------------------------------------------

def _bn_fold(mod, eps=1e-5):
    scale = mod["gamma"] / jnp.sqrt(mod["var"] + eps)
    shift = mod["beta"] - mod["mean"] * scale
    return scale, shift


def _cm_to_nchw(x_cm, nhwc_shape):
    n, h, w, c = nhwc_shape
    return jnp.transpose(x_cm.reshape(c, n, h, w), (1, 0, 2, 3))


def encoder_forward(modules, x_nchw):
    """Analogue of Encoder.forward: iterate top-level modules, expanding
    'blocks' block-by-block, collecting every intermediate (NCHW features).
    Internally activations stay channel-major (C, N*H*W); conv->bn->silu
    chains run as one fused Pallas kernel that still emits every feature."""
    features = [x_nchw]
    n, c, h, w = x_nchw.shape
    cur = jnp.transpose(x_nchw, (1, 0, 2, 3)).reshape(c, n * h * w)
    cur_shape = (n, h, w, c)

    flat = []
    for name, mod in modules:
        if name == "blocks":
            flat.extend(("block", blk) for blk in mod)
        else:
            flat.append((name, mod))

    i = 0
    while i < len(flat):
        _, mod = flat[i]
        t = mod["type"]
        if (t == "conv" and i + 2 < len(flat)
                and flat[i + 1][1]["type"] == "bn"
                and flat[i + 2][1]["type"] == "act"):
            scale, shift = _bn_fold(flat[i + 1][1])
            (conv_o, bn_o, act_o), cur_shape = fused_conv_bn_act(
                cur, cur_shape, mod["w"], mod["stride"], mod["padding"],
                scale, shift, emit_intermediate=True)
            features += [_cm_to_nchw(conv_o, cur_shape),
                         _cm_to_nchw(bn_o, cur_shape),
                         _cm_to_nchw(act_o, cur_shape)]
            cur = act_o
            i += 3
        elif t == "block":      # EfficientNet-style stage: conv -> bn -> silu
            scale, shift = _bn_fold(mod)
            (act_o,), cur_shape = fused_conv_bn_act(
                cur, cur_shape, mod["w"], mod["stride"], mod["padding"],
                scale, shift, emit_intermediate=False)
            features.append(_cm_to_nchw(act_o, cur_shape))
            cur = act_o
            i += 1
        elif t == "conv":       # standalone conv fallback
            ones = jnp.ones((mod["w"].shape[0],), jnp.float32)
            (conv_o,), cur_shape = fused_conv_bn_act(
                cur, cur_shape, mod["w"], mod["stride"], mod["padding"],
                ones, jnp.zeros_like(ones), emit_intermediate=False,
                do_affine=False, do_act=False)
            features.append(_cm_to_nchw(conv_o, cur_shape))
            cur = conv_o
            i += 1
        elif t == "bn":         # standalone bn fallback
            scale, shift = _bn_fold(mod)
            cur = pallas_affine_act(cur, scale, shift,
                                    do_affine=True, do_act=False)
            features.append(_cm_to_nchw(cur, cur_shape))
            i += 1
        elif t == "act":        # standalone silu fallback
            cur = pallas_affine_act(cur, None, None,
                                    do_affine=False, do_act=True)
            features.append(_cm_to_nchw(cur, cur_shape))
            i += 1
        else:
            raise ValueError(t)
    return features


# ----------------------------------------------------------------------------
# Deterministic synthetic backend parameters
# ----------------------------------------------------------------------------

def init_backend(key):
    ks = jax.random.split(key, 16)

    def conv_w(k, cout, cin, kh, kw):
        return 0.1 * jax.random.normal(k, (cout, cin, kh, kw), jnp.float32)

    def bn_p(k, c):
        k1, k2, k3, k4 = jax.random.split(k, 4)
        return dict(
            gamma=1.0 + 0.1 * jax.random.normal(k1, (c,), jnp.float32),
            beta=0.1 * jax.random.normal(k2, (c,), jnp.float32),
            mean=0.1 * jax.random.normal(k3, (c,), jnp.float32),
            var=1.0 + 0.1 * jnp.abs(jax.random.normal(k4, (c,), jnp.float32)),
        )

    modules = [
        ("conv_stem", dict(type="conv", w=conv_w(ks[0], 8, 4, 3, 3),
                           stride=2, padding=1)),
        ("bn1", dict(type="bn", **bn_p(ks[1], 8))),
        ("act1", dict(type="act")),
        ("blocks", [
            dict(type="block", w=conv_w(ks[2], 16, 8, 3, 3),
                 stride=1, padding=1, **bn_p(ks[3], 16)),
            dict(type="block", w=conv_w(ks[4], 16, 16, 3, 3),
                 stride=2, padding=1, **bn_p(ks[5], 16)),
        ]),
        ("conv_head", dict(type="conv", w=conv_w(ks[6], 32, 16, 1, 1),
                           stride=1, padding=0)),
        ("bn2", dict(type="bn", **bn_p(ks[7], 32))),
        ("act2", dict(type="act")),
    ]
    return modules


# ----------------------------------------------------------------------------
# Pure-JAX reference (correctness check only)
# ----------------------------------------------------------------------------

def _ref_conv(x, w, stride, padding):
    return jax.lax.conv_general_dilated(
        x, w, (stride, stride), ((padding, padding), (padding, padding)),
        dimension_numbers=("NCHW", "OIHW", "NCHW"))


def _ref_bn(x, m):
    s = m["gamma"] / jnp.sqrt(m["var"] + 1e-5)
    b = m["beta"] - m["mean"] * s
    return x * s[None, :, None, None] + b[None, :, None, None]


def _ref_apply(mod, x):
    t = mod["type"]
    if t == "conv":
        return _ref_conv(x, mod["w"], mod["stride"], mod["padding"])
    if t == "bn":
        return _ref_bn(x, mod)
    if t == "act":
        return x * jax.nn.sigmoid(x)
    if t == "block":
        y = _ref_conv(x, mod["w"], mod["stride"], mod["padding"])
        y = _ref_bn(y, mod)
        return y * jax.nn.sigmoid(y)
    raise ValueError(t)


def _ref_encoder(modules, x):
    feats = [x]
    for name, mod in modules:
        if name == "blocks":
            for blk in mod:
                feats.append(_ref_apply(blk, feats[-1]))
        else:
            feats.append(_ref_apply(mod, feats[-1]))
    return feats


# ----------------------------------------------------------------------------

if __name__ == "__main__":
    key = jax.random.PRNGKey(0)
    k_param, k_x = jax.random.split(key)
    modules = init_backend(k_param)

    # input layout: NCHW (PyTorch convention)
    x = jax.random.normal(k_x, (2, 4, 16, 16), jnp.float32)

    fwd = jax.jit(functools.partial(encoder_forward, modules))
    feats = fwd(x)
    feats = [jax.block_until_ready(f) for f in feats]

    # correctness check against a pure-JAX reference
    ref = _ref_encoder(modules, x)
    assert len(feats) == len(ref) == 9
    for a, b in zip(feats, ref):
        assert a.shape == b.shape
        assert jnp.allclose(a, b, atol=1e-4, rtol=1e-4)

    print("KERNEL_OK")
</pallas_src>

<mosaic_0001>
module attributes {stable_mosaic.version = 11 : i64} {
  func.func @_conv_bn_act_all_kernel(%arg0: i32, %arg1: memref<36x128xf32, #tpu.memory_space<vmem>>, %arg2: memref<8x36xf32, #tpu.memory_space<vmem>>, %arg3: memref<8x1xf32, #tpu.memory_space<vmem>>, %arg4: memref<8x1xf32, #tpu.memory_space<vmem>>, %arg5: memref<8x128xf32, #tpu.memory_space<vmem>>, %arg6: memref<8x128xf32, #tpu.memory_space<vmem>>, %arg7: memref<8x128xf32, #tpu.memory_space<vmem>>) attributes {dimension_semantics = [#tpu.dimension_semantics<parallel>], iteration_bounds = array<i64: 1>, scalar_prefetch = 0 : i64, scratch_operands = 0 : i64, tpu.core_type = #tpu.core_type<tc>, window_params = [{transform_indices = @transform_0, window_bounds = array<i64: 36, 128>}, {pipeline_mode = #tpu.pipeline_mode<synchronous>, transform_indices = @transform_1, window_bounds = array<i64: 8, 36>}, {pipeline_mode = #tpu.pipeline_mode<synchronous>, transform_indices = @transform_2, window_bounds = array<i64: 8, 1>}, {pipeline_mode = #tpu.pipeline_mode<synchronous>, transform_indices = @transform_3, window_bounds = array<i64: 8, 1>}, {transform_indices = @transform_4, window_bounds = array<i64: 8, 128>}, {transform_indices = @transform_5, window_bounds = array<i64: 8, 128>}, {transform_indices = @transform_6, window_bounds = array<i64: 8, 128>}]} {
    %c0 = arith.constant 0 : index
    %c0_0 = arith.constant 0 : index
    %0 = vector.load %arg2[%c0, %c0_0] : memref<8x36xf32, #tpu.memory_space<vmem>>, vector<8x36xf32>
    %c0_1 = arith.constant 0 : index
    %c0_2 = arith.constant 0 : index
    %1 = vector.load %arg1[%c0_1, %c0_2] : memref<36x128xf32, #tpu.memory_space<vmem>>, vector<36x128xf32>
    %cst = arith.constant dense<0.000000e+00> : vector<8x128xf32>
    %2 = tpu.matmul %0, %1, %cst {dimension_numbers = #tpu.dot_dimension_numbers<[1], [0], [0], [1], [0, 0, 1, 1], [], []>} : vector<8x36xf32>, vector<36x128xf32>, vector<8x128xf32> -> vector<8x128xf32>
    %c0_3 = arith.constant 0 : index
    %c0_4 = arith.constant 0 : index
    %3 = vector.load %arg5[%c0_3, %c0_4] : memref<8x128xf32, #tpu.memory_space<vmem>>, vector<8x128xf32>
    tpu.vector_store %arg5[%c0_3, %c0_4], %2 {strides = array<i32>} : memref<8x128xf32, #tpu.memory_space<vmem>>, vector<8x128xf32>,
    %c0_5 = arith.constant 0 : index
    %c0_6 = arith.constant 0 : index
    %4 = vector.load %arg3[%c0_5, %c0_6] : memref<8x1xf32, #tpu.memory_space<vmem>>, vector<8x1xf32>
    %5 = vector.broadcast %4 : vector<8x1xf32> to vector<8x128xf32>
    %6 = arith.mulf %2, %5 : vector<8x128xf32>
    %c0_7 = arith.constant 0 : index
    %c0_8 = arith.constant 0 : index
    %7 = vector.load %arg4[%c0_7, %c0_8] : memref<8x1xf32, #tpu.memory_space<vmem>>, vector<8x1xf32>
    %8 = vector.broadcast %7 : vector<8x1xf32> to vector<8x128xf32>
    %9 = arith.addf %6, %8 : vector<8x128xf32>
    %c0_9 = arith.constant 0 : index
    %c0_10 = arith.constant 0 : index
    %10 = vector.load %arg6[%c0_9, %c0_10] : memref<8x128xf32, #tpu.memory_space<vmem>>, vector<8x128xf32>
    tpu.vector_store %arg6[%c0_9, %c0_10], %9 {strides = array<i32>} : memref<8x128xf32, #tpu.memory_space<vmem>>, vector<8x128xf32>,
    %11 = arith.negf %9 : vector<8x128xf32>
    %12 = math.exp %11 : vector<8x128xf32>
    %cst_11 = arith.constant 1.000000e+00 : f32
    %13 = vector.broadcast %cst_11 : f32 to vector<8x128xf32>
    %14 = arith.addf %13, %12 : vector<8x128xf32>
    %15 = arith.divf %13, %14 : vector<8x128xf32>
    %16 = arith.mulf %9, %15 : vector<8x128xf32>
    %c0_12 = arith.constant 0 : index
    %c0_13 = arith.constant 0 : index
    %17 = vector.load %arg7[%c0_12, %c0_13] : memref<8x128xf32, #tpu.memory_space<vmem>>, vector<8x128xf32>
    tpu.vector_store %arg7[%c0_12, %c0_13], %16 {strides = array<i32>} : memref<8x128xf32, #tpu.memory_space<vmem>>, vector<8x128xf32>,
    return
  }
  func.func @transform_0(%arg0: i32) -> (i32, i32) {
    %c0_i32 = arith.constant 0 : i32
    %c0_i32_0 = arith.constant 0 : i32
    return %c0_i32, %arg0 : i32, i32
  }
  func.func @transform_1(%arg0: i32) -> (i32, i32) {
    %c0_i32 = arith.constant 0 : i32
    %c0_i32_0 = arith.constant 0 : i32
    %c0_i32_1 = arith.constant 0 : i32
    return %c0_i32, %c0_i32_0 : i32, i32
  }
  func.func @transform_2(%arg0: i32) -> (i32, i32) {
    %c0_i32 = arith.constant 0 : i32
    %c0_i32_0 = arith.constant 0 : i32
    %c0_i32_1 = arith.constant 0 : i32
    return %c0_i32, %c0_i32_0 : i32, i32
  }
  func.func @transform_3(%arg0: i32) -> (i32, i32) {
    %c0_i32 = arith.constant 0 : i32
    %c0_i32_0 = arith.constant 0 : i32
    %c0_i32_1 = arith.constant 0 : i32
    return %c0_i32, %c0_i32_0 : i32, i32
  }
  func.func @transform_4(%arg0: i32) -> (i32, i32) {
    %c0_i32 = arith.constant 0 : i32
    %c0_i32_0 = arith.constant 0 : i32
    return %c0_i32, %arg0 : i32, i32
  }
  func.func @transform_5(%arg0: i32) -> (i32, i32) {
    %c0_i32 = arith.constant 0 : i32
    %c0_i32_0 = arith.constant 0 : i32
    return %c0_i32, %arg0 : i32, i32
  }
  func.func @transform_6(%arg0: i32) -> (i32, i32) {
    %c0_i32 = arith.constant 0 : i32
    %c0_i32_0 = arith.constant 0 : i32
    return %c0_i32, %arg0 : i32, i32
  }
}

module attributes {stable_mosaic.version = 11 : i64} {
  func.func @_conv_epilogue_kernel(%arg0: i32, %arg1: memref<72x128xf32, #tpu.memory_space<vmem>>, %arg2: memref<16x72xf32, #tpu.memory_space<vmem>>, %arg3: memref<16x1xf32, #tpu.memory_space<vmem>>, %arg4: memref<16x1xf32, #tpu.memory_space<vmem>>, %arg5: memref<16x128xf32, #tpu.memory_space<vmem>>) attributes {dimension_semantics = [#tpu.dimension_semantics<parallel>], iteration_bounds = array<i64: 1>, scalar_prefetch = 0 : i64, scratch_operands = 0 : i64, tpu.core_type = #tpu.core_type<tc>, window_params = [{transform_indices = @transform_0, window_bounds = array<i64: 72, 128>}, {pipeline_mode = #tpu.pipeline_mode<synchronous>, transform_indices = @transform_1, window_bounds = array<i64: 16, 72>}, {pipeline_mode = #tpu.pipeline_mode<synchronous>, transform_indices = @transform_2, window_bounds = array<i64: 16, 1>}, {pipeline_mode = #tpu.pipeline_mode<synchronous>, transform_indices = @transform_3, window_bounds = array<i64: 16, 1>}, {transform_indices = @transform_4, window_bounds = array<i64: 16, 128>}]} {
    %c0 = arith.constant 0 : index
    %c0_0 = arith.constant 0 : index
    %0 = vector.load %arg2[%c0, %c0_0] : memref<16x72xf32, #tpu.memory_space<vmem>>, vector<16x72xf32>
    %c0_1 = arith.constant 0 : index
    %c0_2 = arith.constant 0 : index
    %1 = vector.load %arg1[%c0_1, %c0_2] : memref<72x128xf32, #tpu.memory_space<vmem>>, vector<72x128xf32>
    %cst = arith.constant dense<0.000000e+00> : vector<16x128xf32>
    %2 = tpu.matmul %0, %1, %cst {dimension_numbers = #tpu.dot_dimension_numbers<[1], [0], [0], [1], [0, 0, 1, 1], [], []>} : vector<16x72xf32>, vector<72x128xf32>, vector<16x128xf32> -> vector<16x128xf32>
    %c0_3 = arith.constant 0 : index
    %c0_4 = arith.constant 0 : index
    %3 = vector.load %arg3[%c0_3, %c0_4] : memref<16x1xf32, #tpu.memory_space<vmem>>, vector<16x1xf32>
    %4 = vector.broadcast %3 : vector<16x1xf32> to vector<16x128xf32>
    %5 = arith.mulf %2, %4 : vector<16x128xf32>
    %c0_5 = arith.constant 0 : index
    %c0_6 = arith.constant 0 : index
    %6 = vector.load %arg4[%c0_5, %c0_6] : memref<16x1xf32, #tpu.memory_space<vmem>>, vector<16x1xf32>
    %7 = vector.broadcast %6 : vector<16x1xf32> to vector<16x128xf32>
    %8 = arith.addf %5, %7 : vector<16x128xf32>
    %9 = arith.negf %8 : vector<16x128xf32>
    %10 = math.exp %9 : vector<16x128xf32>
    %cst_7 = arith.constant 1.000000e+00 : f32
    %11 = vector.broadcast %cst_7 : f32 to vector<16x128xf32>
    %12 = arith.addf %11, %10 : vector<16x128xf32>
    %13 = arith.divf %11, %12 : vector<16x128xf32>
    %14 = arith.mulf %8, %13 : vector<16x128xf32>
    %c0_8 = arith.constant 0 : index
    %c0_9 = arith.constant 0 : index
    %15 = vector.load %arg5[%c0_8, %c0_9] : memref<16x128xf32, #tpu.memory_space<vmem>>, vector<16x128xf32>
    tpu.vector_store %arg5[%c0_8, %c0_9], %14 {strides = array<i32>} : memref<16x128xf32, #tpu.memory_space<vmem>>, vector<16x128xf32>,
    return
  }
  func.func @transform_0(%arg0: i32) -> (i32, i32) {
    %c0_i32 = arith.constant 0 : i32
    %c0_i32_0 = arith.constant 0 : i32
    return %c0_i32, %arg0 : i32, i32
  }
  func.func @transform_1(%arg0: i32) -> (i32, i32) {
    %c0_i32 = arith.constant 0 : i32
    %c0_i32_0 = arith.constant 0 : i32
    %c0_i32_1 = arith.constant 0 : i32
    return %c0_i32, %c0_i32_0 : i32, i32
  }
  func.func @transform_2(%arg0: i32) -> (i32, i32) {
    %c0_i32 = arith.constant 0 : i32
    %c0_i32_0 = arith.constant 0 : i32
    %c0_i32_1 = arith.constant 0 : i32
    return %c0_i32, %c0_i32_0 : i32, i32
  }
  func.func @transform_3(%arg0: i32) -> (i32, i32) {
    %c0_i32 = arith.constant 0 : i32
    %c0_i32_0 = arith.constant 0 : i32
    %c0_i32_1 = arith.constant 0 : i32
    return %c0_i32, %c0_i32_0 : i32, i32
  }
  func.func @transform_4(%arg0: i32) -> (i32, i32) {
    %c0_i32 = arith.constant 0 : i32
    %c0_i32_0 = arith.constant 0 : i32
    return %c0_i32, %arg0 : i32, i32
  }
}

module attributes {stable_mosaic.version = 11 : i64} {
  func.func @_conv_epilogue_kernel(%arg0: i32, %arg1: memref<144x32xf32, #tpu.memory_space<vmem>>, %arg2: memref<16x144xf32, #tpu.memory_space<vmem>>, %arg3: memref<16x1xf32, #tpu.memory_space<vmem>>, %arg4: memref<16x1xf32, #tpu.memory_space<vmem>>, %arg5: memref<16x32xf32, #tpu.memory_space<vmem>>) attributes {dimension_semantics = [#tpu.dimension_semantics<parallel>], iteration_bounds = array<i64: 1>, scalar_prefetch = 0 : i64, scratch_operands = 0 : i64, tpu.core_type = #tpu.core_type<tc>, window_params = [{transform_indices = @transform_0, window_bounds = array<i64: 144, 32>}, {pipeline_mode = #tpu.pipeline_mode<synchronous>, transform_indices = @transform_1, window_bounds = array<i64: 16, 144>}, {pipeline_mode = #tpu.pipeline_mode<synchronous>, transform_indices = @transform_2, window_bounds = array<i64: 16, 1>}, {pipeline_mode = #tpu.pipeline_mode<synchronous>, transform_indices = @transform_3, window_bounds = array<i64: 16, 1>}, {transform_indices = @transform_4, window_bounds = array<i64: 16, 32>}]} {
    %c0 = arith.constant 0 : index
    %c0_0 = arith.constant 0 : index
    %0 = vector.load %arg2[%c0, %c0_0] : memref<16x144xf32, #tpu.memory_space<vmem>>, vector<16x144xf32>
    %c0_1 = arith.constant 0 : index
    %c0_2 = arith.constant 0 : index
    %1 = vector.load %arg1[%c0_1, %c0_2] : memref<144x32xf32, #tpu.memory_space<vmem>>, vector<144x32xf32>
    %cst = arith.constant dense<0.000000e+00> : vector<16x32xf32>
    %2 = tpu.matmul %0, %1, %cst {dimension_numbers = #tpu.dot_dimension_numbers<[1], [0], [0], [1], [0, 0, 1, 1], [], []>} : vector<16x144xf32>, vector<144x32xf32>, vector<16x32xf32> -> vector<16x32xf32>
    %c0_3 = arith.constant 0 : index
    %c0_4 = arith.constant 0 : index
    %3 = vector.load %arg3[%c0_3, %c0_4] : memref<16x1xf32, #tpu.memory_space<vmem>>, vector<16x1xf32>
    %4 = vector.broadcast %3 : vector<16x1xf32> to vector<16x32xf32>
    %5 = arith.mulf %2, %4 : vector<16x32xf32>
    %c0_5 = arith.constant 0 : index
    %c0_6 = arith.constant 0 : index
    %6 = vector.load %arg4[%c0_5, %c0_6] : memref<16x1xf32, #tpu.memory_space<vmem>>, vector<16x1xf32>
    %7 = vector.broadcast %6 : vector<16x1xf32> to vector<16x32xf32>
    %8 = arith.addf %5, %7 : vector<16x32xf32>
    %9 = arith.negf %8 : vector<16x32xf32>
    %10 = math.exp %9 : vector<16x32xf32>
    %cst_7 = arith.constant 1.000000e+00 : f32
    %11 = vector.broadcast %cst_7 : f32 to vector<16x32xf32>
    %12 = arith.addf %11, %10 : vector<16x32xf32>
    %13 = arith.divf %11, %12 : vector<16x32xf32>
    %14 = arith.mulf %8, %13 : vector<16x32xf32>
    %c0_8 = arith.constant 0 : index
    %c0_9 = arith.constant 0 : index
    %15 = vector.load %arg5[%c0_8, %c0_9] : memref<16x32xf32, #tpu.memory_space<vmem>>, vector<16x32xf32>
    tpu.vector_store %arg5[%c0_8, %c0_9], %14 {strides = array<i32>} : memref<16x32xf32, #tpu.memory_space<vmem>>, vector<16x32xf32>,
    return
  }
  func.func @transform_0(%arg0: i32) -> (i32, i32) {
    %c0_i32 = arith.constant 0 : i32
    %c0_i32_0 = arith.constant 0 : i32
    return %c0_i32, %arg0 : i32, i32
  }
  func.func @transform_1(%arg0: i32) -> (i32, i32) {
    %c0_i32 = arith.constant 0 : i32
    %c0_i32_0 = arith.constant 0 : i32
    %c0_i32_1 = arith.constant 0 : i32
    return %c0_i32, %c0_i32_0 : i32, i32
  }
  func.func @transform_2(%arg0: i32) -> (i32, i32) {
    %c0_i32 = arith.constant 0 : i32
    %c0_i32_0 = arith.constant 0 : i32
    %c0_i32_1 = arith.constant 0 : i32
    return %c0_i32, %c0_i32_0 : i32, i32
  }
  func.func @transform_3(%arg0: i32) -> (i32, i32) {
    %c0_i32 = arith.constant 0 : i32
    %c0_i32_0 = arith.constant 0 : i32
    %c0_i32_1 = arith.constant 0 : i32
    return %c0_i32, %c0_i32_0 : i32, i32
  }
  func.func @transform_4(%arg0: i32) -> (i32, i32) {
    %c0_i32 = arith.constant 0 : i32
    %c0_i32_0 = arith.constant 0 : i32
    return %c0_i32, %arg0 : i32, i32
  }
}

module attributes {stable_mosaic.version = 11 : i64} {
  func.func @_conv_bn_act_all_kernel(%arg0: i32, %arg1: memref<16x32xf32, #tpu.memory_space<vmem>>, %arg2: memref<32x16xf32, #tpu.memory_space<vmem>>, %arg3: memref<32x1xf32, #tpu.memory_space<vmem>>, %arg4: memref<32x1xf32, #tpu.memory_space<vmem>>, %arg5: memref<32x32xf32, #tpu.memory_space<vmem>>, %arg6: memref<32x32xf32, #tpu.memory_space<vmem>>, %arg7: memref<32x32xf32, #tpu.memory_space<vmem>>) attributes {dimension_semantics = [#tpu.dimension_semantics<parallel>], iteration_bounds = array<i64: 1>, scalar_prefetch = 0 : i64, scratch_operands = 0 : i64, tpu.core_type = #tpu.core_type<tc>, window_params = [{transform_indices = @transform_0, window_bounds = array<i64: 16, 32>}, {pipeline_mode = #tpu.pipeline_mode<synchronous>, transform_indices = @transform_1, window_bounds = array<i64: 32, 16>}, {pipeline_mode = #tpu.pipeline_mode<synchronous>, transform_indices = @transform_2, window_bounds = array<i64: 32, 1>}, {pipeline_mode = #tpu.pipeline_mode<synchronous>, transform_indices = @transform_3, window_bounds = array<i64: 32, 1>}, {transform_indices = @transform_4, window_bounds = array<i64: 32, 32>}, {transform_indices = @transform_5, window_bounds = array<i64: 32, 32>}, {transform_indices = @transform_6, window_bounds = array<i64: 32, 32>}]} {
    %c0 = arith.constant 0 : index
    %c0_0 = arith.constant 0 : index
    %0 = vector.load %arg2[%c0, %c0_0] : memref<32x16xf32, #tpu.memory_space<vmem>>, vector<32x16xf32>
    %c0_1 = arith.constant 0 : index
    %c0_2 = arith.constant 0 : index
    %1 = vector.load %arg1[%c0_1, %c0_2] : memref<16x32xf32, #tpu.memory_space<vmem>>, vector<16x32xf32>
    %cst = arith.constant dense<0.000000e+00> : vector<32x32xf32>
    %2 = tpu.matmul %0, %1, %cst {dimension_numbers = #tpu.dot_dimension_numbers<[1], [0], [0], [1], [0, 0, 1, 1], [], []>} : vector<32x16xf32>, vector<16x32xf32>, vector<32x32xf32> -> vector<32x32xf32>
    %c0_3 = arith.constant 0 : index
    %c0_4 = arith.constant 0 : index
    %3 = vector.load %arg5[%c0_3, %c0_4] : memref<32x32xf32, #tpu.memory_space<vmem>>, vector<32x32xf32>
    tpu.vector_store %arg5[%c0_3, %c0_4], %2 {strides = array<i32>} : memref<32x32xf32, #tpu.memory_space<vmem>>, vector<32x32xf32>,
    %c0_5 = arith.constant 0 : index
    %c0_6 = arith.constant 0 : index
    %4 = vector.load %arg3[%c0_5, %c0_6] : memref<32x1xf32, #tpu.memory_space<vmem>>, vector<32x1xf32>
    %5 = vector.broadcast %4 : vector<32x1xf32> to vector<32x32xf32>
    %6 = arith.mulf %2, %5 : vector<32x32xf32>
    %c0_7 = arith.constant 0 : index
    %c0_8 = arith.constant 0 : index
    %7 = vector.load %arg4[%c0_7, %c0_8] : memref<32x1xf32, #tpu.memory_space<vmem>>, vector<32x1xf32>
    %8 = vector.broadcast %7 : vector<32x1xf32> to vector<32x32xf32>
    %9 = arith.addf %6, %8 : vector<32x32xf32>
    %c0_9 = arith.constant 0 : index
    %c0_10 = arith.constant 0 : index
    %10 = vector.load %arg6[%c0_9, %c0_10] : memref<32x32xf32, #tpu.memory_space<vmem>>, vector<32x32xf32>
    tpu.vector_store %arg6[%c0_9, %c0_10], %9 {strides = array<i32>} : memref<32x32xf32, #tpu.memory_space<vmem>>, vector<32x32xf32>,
    %11 = arith.negf %9 : vector<32x32xf32>
    %12 = math.exp %11 : vector<32x32xf32>
    %cst_11 = arith.constant 1.000000e+00 : f32
    %13 = vector.broadcast %cst_11 : f32 to vector<32x32xf32>
    %14 = arith.addf %13, %12 : vector<32x32xf32>
    %15 = arith.divf %13, %14 : vector<32x32xf32>
    %16 = arith.mulf %9, %15 : vector<32x32xf32>
    %c0_12 = arith.constant 0 : index
    %c0_13 = arith.constant 0 : index
    %17 = vector.load %arg7[%c0_12, %c0_13] : memref<32x32xf32, #tpu.memory_space<vmem>>, vector<32x32xf32>
    tpu.vector_store %arg7[%c0_12, %c0_13], %16 {strides = array<i32>} : memref<32x32xf32, #tpu.memory_space<vmem>>, vector<32x32xf32>,
    return
  }
  func.func @transform_0(%arg0: i32) -> (i32, i32) {
    %c0_i32 = arith.constant 0 : i32
    %c0_i32_0 = arith.constant 0 : i32
    return %c0_i32, %arg0 : i32, i32
  }
  func.func @transform_1(%arg0: i32) -> (i32, i32) {
    %c0_i32 = arith.constant 0 : i32
    %c0_i32_0 = arith.constant 0 : i32
    %c0_i32_1 = arith.constant 0 : i32
    return %c0_i32, %c0_i32_0 : i32, i32
  }
  func.func @transform_2(%arg0: i32) -> (i32, i32) {
    %c0_i32 = arith.constant 0 : i32
    %c0_i32_0 = arith.constant 0 : i32
    %c0_i32_1 = arith.constant 0 : i32
    return %c0_i32, %c0_i32_0 : i32, i32
  }
  func.func @transform_3(%arg0: i32) -> (i32, i32) {
    %c0_i32 = arith.constant 0 : i32
    %c0_i32_0 = arith.constant 0 : i32
    %c0_i32_1 = arith.constant 0 : i32
    return %c0_i32, %c0_i32_0 : i32, i32
  }
  func.func @transform_4(%arg0: i32) -> (i32, i32) {
    %c0_i32 = arith.constant 0 : i32
    %c0_i32_0 = arith.constant 0 : i32
    return %c0_i32, %arg0 : i32, i32
  }
  func.func @transform_5(%arg0: i32) -> (i32, i32) {
    %c0_i32 = arith.constant 0 : i32
    %c0_i32_0 = arith.constant 0 : i32
    return %c0_i32, %arg0 : i32, i32
  }
  func.func @transform_6(%arg0: i32) -> (i32, i32) {
    %c0_i32 = arith.constant 0 : i32
    %c0_i32_0 = arith.constant 0 : i32
    return %c0_i32, %arg0 : i32, i32
  }
}

</mosaic_0001>

<bundles_post_ra>
// kernel: encoder_forward.4
= control target key start
LH: loop header
LB: loop body
LE: loop exit
PB: predicated region body
PF: predicated region fallthrough
CT: control target
= control target key end

     0   :  { %v177_v0 = vmov 0.0|0.0   ;;  %vm178_vm0 = vmmov 0   ;;  %v179_v4 = vmov 0.0   ;;  %v180_v7 = vmov 0   ;;  %s249_s0 = inlined_call_operand.vmem [shape: f32[36,128], index: 0, kind: input, shape index: {}]   ;;  %s250_s2 = inlined_call_operand.vmem [shape: f32[8,1], index: 2, kind: input, shape index: {}]   ;;  %s251_s3 = inlined_call_operand.vmem [shape: f32[8,1], index: 3, kind: input, shape index: {}]   ;;  %s252_s1 = inlined_call_operand.vmem [shape: f32[8,36], index: 1, kind: input, shape index: {}]   ;;  %s253_s4 = inlined_call_operand.vmem [shape: f32[8,128], index: 4, kind: output, shape index: {0}]   ;;  %s254_s5 = inlined_call_operand.vmem [shape: f32[8,128], index: 5, kind: output, shape index: {1}]   ;;  %s255_s6 = inlined_call_operand.vmem [shape: f32[8,128], index: 6, kind: output, shape index: {2}]  }
   0x1   :  { %162 = vmatprep.subr.bf16.mxu0 %v177_v0  ;;  %v21_v1 = vld [vmem:[%s249_s0] sm:$0xff]  ;;  %v22_v2 = vld [vmem:[%s249_s0 + $0x8] sm:$0xff]  ;;  %v23_v3 = vld [vmem:[%s249_s0 + $0x10] sm:$0xff]  ;;  %159 = vmatprep.mubr.msk.f32.mxu0 %vm178_vm0, %v179_v4  ;;  %vm30_vm1 = vcmask 1043456   ;;  %vm26_vm2 = vcmask 293888  }
   0x2   :  { %v163_v5 = vpack.c.bf16 %v22_v2, %v21_v1  ;;  %v24_v6 = vld [vmem:[%s249_s0 + $0x18] sm:$0xff]  ;;  %172 = vset.pattern.permute.xlu0 %v180_v7  ;;  %v105_v8 = vld [vmem:[%s250_s2] sm:$0xff] }
   0x3   :  { %v166_v9 = vpack.c.bf16 %v24_v6, %v23_v3  ;;  %108 = vperm.xlu0 %172, %v105_v8   ;;  %v112_v10 = vld [vmem:[%s251_s3] sm:$0xff] }
   0x4   :  { %164 = vmatpush3.bf16.msra.mxu0 %v163_v5  ;;  %v25_v11 = vld [vmem:[%s249_s0 + $0x20] sm:$0xf] }
   0x5   :  { %165 = vmatprep.subr.bf16.mxu0 %v177_v0  ;;  %v20_v12 = vld [vmem:[%s252_s1] sm:$0xff] }
   0x7   :  { %115 = vperm.xlu0 %172, %v112_v10  }
   0x8   :  { %167 = vmatpush3.bf16.msra.mxu0 %v166_v9 }
   0x9   :  { %157 = vmatprep.subr.mxu0 %v179_v4 }
   0xc   :  { %158 = vmatpush3.msk.msra.mxu0 %vm30_vm1, %v25_v11 }
   0xd   :  { %160 = vmatmul.mubr.msk.f32.vlgmr.msra.gmra.mrb[0].mxu0 %vm26_vm2, %v20_v12 }
  0x82   :  { %v109_v13 = vpop.permute.xlu0 %108 }
  0x86   :  { %v116_v17 = vpop.permute.xlu0 %115 }
  0xe0   :  { %v100_v14 = vpop.f32.mrb[0].mxu0 }
  0xe1   :  { %104 = vst [vmem:[%s253_s4] sm:$0xff] %v100_v14  ;;  %v111_v15 = vmul.f32 %v109_v13, %v100_v14  ;;  %v161_v16 = vpop.f32.mrb[1].mxu0 }
  0xe3   :  { %v118_v18 = vadd.f32 %v116_v17, %v111_v15 }
  0xe5   :  { %119 = vst [vmem:[%s254_s5] sm:$0xff] %v118_v18  ;;  %v142_v19 = vmul.f32 -1.442695, %v118_v18 }
  0xe7   :  { %173 = vpow2.f32 %v142_v19 }
  0xf1   :  { %v174_v20 = vpop.eup %173 }
  0xf2   :  { %v123_v21 = vadd.f32 1.0, %v174_v20 }
  0xf4   :  { %175 = vrcp.f32 %v123_v21 }
  0xfe   :  { %v176_v22 = vpop.eup %175 }
  0xff   :  { %v126_v23 = vmul.f32 %v176_v22, %v118_v18 }
 0x101   :  { %127 = vst [vmem:[%s255_s6] sm:$0xff] %v126_v23 }

// kernel: encoder_forward.5
= control target key start
LH: loop header
LB: loop body
LE: loop exit
PB: predicated region body
PF: predicated region fallthrough
CT: control target
= control target key end

     0   :  { %v221_v3 = vmov 0   ;;  %vm28_vm0 = vcmask 588800   ;;  %s300_s0 = inlined_call_operand.vmem [shape: f32[72,128], index: 0, kind: input, shape index: {}]   ;;  %s301_s1 = inlined_call_operand.vmem [shape: f32[16,72], index: 1, kind: input, shape index: {}]   ;;  %s302_s2 = inlined_call_operand.vmem [shape: f32[16,1], index: 2, kind: input, shape index: {}]   ;;  %s303_s3 = inlined_call_operand.vmem [shape: f32[16,1], index: 3, kind: input, shape index: {}]   ;;  %s304_s4 = inlined_call_operand.vmem [shape: f32[16,128], index: 4, kind: output, shape index: {}]  }
   0x1   :  { %v19_v0 = vld [vmem:[%s300_s0] sm:$0xff]  ;;  %v20_v1 = vld [vmem:[%s300_s0 + $0x8] sm:$0xff]  ;;  %v21_v2 = vld [vmem:[%s300_s0 + $0x10] sm:$0xff]  ;;  %211 = vset.pattern.permute.xlu0 %v221_v3  ;;  %212 = vset.pattern.permute.xlu1 %v221_v3 }
   0x2   :  { %v194_v4 = vpack.c.bf16 %v20_v1, %v19_v0  ;;  %v22_v5 = vld [vmem:[%s300_s0 + $0x18] sm:$0xff]  ;;  %v23_v7 = vld [vmem:[%s300_s0 + $0x20] sm:$0xff]  ;;  %v24_v8 = vld [vmem:[%s300_s0 + $0x28] sm:$0xff] }
   0x3   :  { %v198_v6 = vpack.c.bf16 %v22_v5, %v21_v2  ;;  %v17_v9 = vld [vmem:[%s301_s1] sm:$0xff]  ;;  %v202_v12 = vpack.c.bf16 %v24_v8, %v23_v7  ;;  %v25_v13 = vld [vmem:[%s300_s0 + $0x30] sm:$0xff]  ;;  %v26_v14 = vld [vmem:[%s300_s0 + $0x38] sm:$0xff] }
   0x4   :  { %195 = vmatprep.subr.bf16.mxu0 %v194_v4  ;;  %v110_v10 = vld [vmem:[%s302_s2] sm:$0xff]  ;;  %191 = vmatprep.mubr.msk.f32.mxu0 %vm28_vm0, %v17_v9  ;;  %v111_v15 = vld [vmem:[%s302_s2 + $0x8] sm:$0xff]  ;;  %v206_v17 = vpack.c.bf16 %v26_v14, %v25_v13 }
   0x5   :  { %197 = vmatpush3.bf16.msra.mxu0 %v194_v4  ;;  %v124_v11 = vld [vmem:[%s303_s3] sm:$0xff]  ;;  %114 = vperm.xlu0 %211, %v110_v10   ;;  %v125_v16 = vld [vmem:[%s303_s3 + $0x8] sm:$0xff] }
   0x6   :  { %199 = vmatprep.subr.bf16.mxu0 %v198_v6  ;;  %128 = vperm.xlu1 %212, %v124_v11   ;;  %v27_v18 = vld [vmem:[%s300_s0 + $0x40] sm:$0xff]  ;;  %v18_v19 = vld [vmem:[%s301_s1 + $0x8] sm:$0xff] }
   0x9   :  { %201 = vmatpush3.bf16.msra.mxu0 %v198_v6  ;;  %119 = vperm.xlu0 %211, %v111_v15  }
   0xa   :  { %203 = vmatprep.subr.bf16.mxu0 %v202_v12  ;;  %133 = vperm.xlu1 %212, %v125_v16  }
   0xd   :  { %205 = vmatpush3.bf16.msra.mxu0 %v202_v12 }
   0xe   :  { %207 = vmatprep.subr.bf16.mxu0 %v206_v17 }
  0x11   :  { %209 = vmatpush3.bf16.msra.mxu0 %v206_v17 }
  0x12   :  { %189 = vmatprep.subr.mxu0 %v27_v18 }
  0x15   :  { %190 = vmatpush3.msra.mxu0 %v27_v18 }
  0x16   :  { %192 = vmatmul.mubr.msk.f32.vlgmr.msra.gmra.mrb[0].mxu0 %vm28_vm0, %v18_v19 }
  0x84   :  { %v115_v20 = vpop.permute.xlu0 %114 }
  0x85   :  { %v129_v21 = vpop.permute.xlu1 %128 }
  0x88   :  { %v120_v22 = vpop.permute.xlu0 %119 }
  0x89   :  { %v134_v26 = vpop.permute.xlu1 %133 }
  0xe9   :  { %v193_v23 = vpop.f32.mrb[0].mxu0 }
  0xea   :  { %v123_v24 = vmul.f32 %v193_v23, %v120_v22  ;;  %v101_v25 = vpop.f32.mrb[1].mxu0 }
  0xeb   :  { %v122_v27 = vmul.f32 %v115_v20, %v101_v25 }
  0xec   :  { %v137_v28 = vadd.f32 %v134_v26, %v123_v24 }
  0xed   :  { %v136_v29 = vadd.f32 %v129_v21, %v122_v27 }
  0xee   :  { %v161_v30 = vmul.f32 -1.442695, %v137_v28 }
  0xef   :  { %v160_v31 = vmul.f32 -1.442695, %v136_v29 }
  0xf0   :  { %213 = vpow2.f32 %v161_v30 }
  0xf1   :  { %215 = vpow2.f32 %v160_v31 }
  0xfa   :  { %v214_v32 = vpop.eup %213 }
  0xfb   :  { %v216_v33 = vpop.eup %215  ;;  %v145_v34 = vadd.f32 1.0, %v214_v32 }
  0xfc   :  { %v144_v35 = vadd.f32 1.0, %v216_v33 }
  0xfd   :  { %217 = vrcp.f32 %v145_v34 }
  0xfe   :  { %219 = vrcp.f32 %v144_v35 }
 0x107   :  { %v218_v36 = vpop.eup %217 }
 0x108   :  { %v220_v37 = vpop.eup %219  ;;  %v151_v38 = vmul.f32 %v218_v36, %v137_v28 }
 0x109   :  { %v150_v39 = vmul.f32 %v220_v37, %v136_v29 }
 0x10a   :  { %153 = vst [vmem:[%s304_s4 + $0x8] sm:$0xff] %v151_v38 }
 0x10b   :  { %152 = vst [vmem:[%s304_s4] sm:$0xff] %v150_v39 }

// kernel: encoder_forward.6
= control target key start
LH: loop header
LB: loop body
LE: loop exit
PB: predicated region body
PF: predicated region fallthrough
CT: control target
= control target key end

     0   :  { %v231_v0 = vmov 0.0|0.0   ;;  %v232_v6 = vmov 0   ;;  %vm39_vm0 = vcmask 130048   ;;  %vm163_vm1 = vcmask 261120   ;;  %s360_s0 = inlined_call_operand.vmem [shape: f32[144,32], index: 0, kind: input, shape index: {}]   ;;  %s361_s1 = inlined_call_operand.vmem [shape: f32[16,144], index: 1, kind: input, shape index: {}]   ;;  %s362_s2 = inlined_call_operand.vmem [shape: f32[16,1], index: 2, kind: input, shape index: {}]   ;;  %s363_s3 = inlined_call_operand.vmem [shape: f32[16,1], index: 3, kind: input, shape index: {}]   ;;  %s364_s4 = inlined_call_operand.vmem [shape: f32[16,32], index: 4, kind: output, shape index: {}]  }
   0x1   :  { %174 = vmatprep.subr.bf16.mxu0 %v231_v0  ;;  %201 = vmatprep.subr.bf16.mxu1 %v231_v0  ;;  %v21_v1 = vld [vmem:[%s360_s0] sm:$0xff]  ;;  %v22_v2 = vld [vmem:[%s360_s0 + $0x8] sm:$0xff]  ;;  %v23_v3 = vld [vmem:[%s360_s0 + $0x10] sm:$0xff] }
   0x2   :  { %v175_v4 = vpack.c.bf16 %v22_v2, %v21_v1  ;;  %v24_v5 = vld [vmem:[%s360_s0 + $0x18] sm:$0xff]  ;;  %221 = vset.pattern.permute.xlu0 %v232_v6  ;;  %222 = vset.pattern.permute.xlu1 %v232_v6  ;;  %v25_v8 = vld [vmem:[%s360_s0 + $0x20] sm:$0xff]  ;;  %v26_v9 = vld [vmem:[%s360_s0 + $0x28] sm:$0xff] }
   0x3   :  { %v178_v7 = vpack.c.bf16 %v24_v5, %v23_v3  ;;  %v18_v10 = vld [vmem:[%s361_s1 + $0x8] sm:$0xff]  ;;  %v20_v11 = vld [vmem:[%s361_s1 + $0x18] sm:$0xff]  ;;  %v181_v12 = vpack.c.bf16 %v26_v9, %v25_v8  ;;  %v121_v13 = vld [vmem:[%s362_s2] sm:$0xff] }
   0x4   :  { %176 = vmatpush1.bf16.msra.mxu0 %v175_v4  ;;  %210 = vmatpush1.bf16.msra.mxu1 %v175_v4  ;;  %v135_v14 = vld [vmem:[%s363_s3] sm:$0xff]  ;;  %v27_v15 = vld [vmem:[%s360_s0 + $0x30] sm:$0xff]  ;;  %v28_v16 = vld [vmem:[%s360_s0 + $0x38] sm:$0xff] }
   0x5   :  { %177 = vmatprep.subr.bf16.mxu0 %v231_v0  ;;  %202 = vmatprep.subr.bf16.mxu1 %v231_v0  ;;  %v184_v17 = vpack.c.bf16 %v28_v16, %v27_v15  ;;  %v122_v18 = vld [vmem:[%s362_s2 + $0x8] sm:$0xff]  ;;  %v29_v20 = vld [vmem:[%s360_s0 + $0x40] sm:$0xff]  ;;  %v31_v23 = vld [vmem:[%s360_s0 + $0x50] sm:$0xff] }
   0x6   :  { %170 = vmatprep.mubr.msk.f32.mxu0 %vm39_vm0, %v18_v10  ;;  %171 = vmatprep.mubr.msk.f32.mxu1 %vm39_vm0, %v20_v11  ;;  %v136_v19 = vld [vmem:[%s363_s3 + $0x8] sm:$0xff]  ;;  %v32_v24 = vld [vmem:[%s360_s0 + $0x58] sm:$0xff]  ;;  %v33_v26 = vld [vmem:[%s360_s0 + $0x60] sm:$0xff] }
   0x7   :  { %125 = vperm.xlu0 %221, %v121_v13   ;;  %139 = vperm.xlu1 %222, %v135_v14   ;;  %v30_v21 = vld [vmem:[%s360_s0 + $0x48] sm:$0xff]  ;;  %v190_v25 = vpack.c.bf16 %v32_v24, %v31_v23  ;;  %v35_v29 = vld [vmem:[%s360_s0 + $0x70] sm:$0xff]  ;;  %v36_v30 = vld [vmem:[%s360_s0 + $0x78] sm:$0xff] }
   0x8   :  { %179 = vmatpush1.bf16.msra.mxu0 %v178_v7  ;;  %211 = vmatpush1.bf16.msra.mxu1 %v178_v7  ;;  %v187_v22 = vpack.c.bf16 %v30_v21, %v29_v20  ;;  %v34_v27 = vld [vmem:[%s360_s0 + $0x68] sm:$0xff]  ;;  %v196_v31 = vpack.c.bf16 %v36_v30, %v35_v29  ;;  %v37_v32 = vld [vmem:[%s360_s0 + $0x80] sm:$0xff]  ;;  %v19_v36 = vld [vmem:[%s361_s1 + $0x10] sm:$0xff] }
   0x9   :  { %180 = vmatprep.subr.bf16.mxu0 %v231_v0  ;;  %203 = vmatprep.subr.bf16.mxu1 %v231_v0  ;;  %v193_v28 = vpack.c.bf16 %v34_v27, %v33_v26  ;;  %v38_v33 = vld [vmem:[%s360_s0 + $0x88] sm:$0xff]  ;;  %v17_v35 = vld [vmem:[%s361_s1] sm:$0xff] }
   0xa   :  { %v199_v34 = vpack.c.bf16 %v38_v33, %v37_v32 }
   0xb   :  { %130 = vperm.xlu0 %221, %v122_v18   ;;  %144 = vperm.xlu1 %222, %v136_v19  }
   0xc   :  { %182 = vmatpush1.bf16.msra.mxu0 %v181_v12  ;;  %212 = vmatpush1.bf16.msra.mxu1 %v181_v12 }
   0xd   :  { %183 = vmatprep.subr.bf16.mxu0 %v231_v0  ;;  %204 = vmatprep.subr.bf16.mxu1 %v231_v0 }
  0x10   :  { %185 = vmatpush1.bf16.msra.mxu0 %v184_v17  ;;  %213 = vmatpush1.bf16.msra.mxu1 %v184_v17 }
  0x11   :  { %186 = vmatprep.subr.bf16.mxu0 %v231_v0  ;;  %205 = vmatprep.subr.bf16.mxu1 %v231_v0 }
  0x14   :  { %188 = vmatpush1.bf16.msra.mxu0 %v187_v22  ;;  %214 = vmatpush1.bf16.msra.mxu1 %v187_v22 }
  0x15   :  { %189 = vmatprep.subr.bf16.mxu0 %v231_v0  ;;  %206 = vmatprep.subr.bf16.mxu1 %v231_v0 }
  0x18   :  { %191 = vmatpush1.bf16.msra.mxu0 %v190_v25  ;;  %215 = vmatpush1.bf16.msra.mxu1 %v190_v25 }
  0x19   :  { %192 = vmatprep.subr.bf16.mxu0 %v231_v0  ;;  %207 = vmatprep.subr.bf16.mxu1 %v231_v0 }
  0x1c   :  { %194 = vmatpush1.bf16.msra.mxu0 %v193_v28  ;;  %216 = vmatpush1.bf16.msra.mxu1 %v193_v28 }
  0x1d   :  { %195 = vmatprep.subr.bf16.mxu0 %v231_v0  ;;  %208 = vmatprep.subr.bf16.mxu1 %v231_v0 }
  0x20   :  { %197 = vmatpush1.bf16.msra.mxu0 %v196_v31  ;;  %217 = vmatpush1.bf16.msra.mxu1 %v196_v31 }
  0x21   :  { %198 = vmatprep.subr.bf16.mxu0 %v231_v0  ;;  %209 = vmatprep.subr.bf16.mxu1 %v231_v0 }
  0x24   :  { %200 = vmatpush1.bf16.msra.mxu0 %v199_v34  ;;  %218 = vmatpush1.bf16.msra.mxu1 %v199_v34 }
  0x27   :  { %111 = vmatmul.mubr.f32.vlgmr.msra.gmra.mrb[0].mxu0 %v17_v35  ;;  %116 = vmatmul.mubr.f32.vlgmr.msra.gmra.mrb[0].mxu1 %v19_v36 }
  0x86   :  { %v126_v37 = vpop.permute.xlu0 %125  ;;  %v140_v38 = vpop.permute.xlu1 %139 }
  0x8a   :  { %v131_v39 = vpop.permute.xlu0 %130  ;;  %v145_v46 = vpop.permute.xlu1 %144 }
  0xfa   :  { %v112_v40 = vpop.f32.mrb[0].mxu0  ;;  %v117_v41 = vpop.f32.mrb[0].mxu1 }
  0xfb   :  { %v133_v42 = vmul.f32 %v126_v37, %v112_v40  ;;  %v134_v43 = vmul.f32 %v131_v39, %v117_v41  ;;  %v114_v44 = vpop.f32.mrb[1].mxu0  ;;  %v119_v45 = vpop.f32.mrb[1].mxu1 }
  0xfd   :  { %v147_v47 = vadd.f32 %v140_v38, %v133_v42  ;;  %v148_v48 = vadd.f32 %v145_v46, %v134_v43 }
  0xff   :  { %v172_v49 = vmul.f32 -1.442695, %v147_v47  ;;  %v173_v50 = vmul.f32 -1.442695, %v148_v48 }
 0x101   :  { %223 = vpow2.f32 %v172_v49 }
 0x102   :  { %225 = vpow2.f32 %v173_v50 }
 0x10b   :  { %v224_v51 = vpop.eup %223 }
 0x10c   :  { %v226_v52 = vpop.eup %225  ;;  %v155_v53 = vadd.f32 1.0, %v224_v51 }
 0x10d   :  { %v156_v54 = vadd.f32 1.0, %v226_v52 }
 0x10e   :  { %227 = vrcp.f32 %v155_v53 }
 0x10f   :  { %229 = vrcp.f32 %v156_v54 }
 0x118   :  { %v228_v55 = vpop.eup %227 }
 0x119   :  { %v230_v56 = vpop.eup %229  ;;  %v161_v57 = vmul.f32 %v228_v55, %v147_v47 }
 0x11a   :  { %v162_v58 = vmul.f32 %v230_v56, %v148_v48 }
 0x11b   :  { %164 = vst.msk [vmem:[%s364_s4] sm:$0xff] %vm163_vm1, %v161_v57 }
 0x11c   :  { %165 = vst.msk [vmem:[%s364_s4 + $0x8] sm:$0xff] %vm163_vm1, %v162_v58 }

// kernel: encoder_forward.7
= control target key start
LH: loop header
LB: loop body
LE: loop exit
PB: predicated region body
PF: predicated region fallthrough
CT: control target
= control target key end

     0   :  { %vm26_vm0 = vcmask 130048   ;;  %v282_v3 = vmov 0   ;;  %vm124_vm1 = vcmask 261120   ;;  %s412_s0 = inlined_call_operand.vmem [shape: f32[16,32], index: 0, kind: input, shape index: {}]   ;;  %s413_s1 = inlined_call_operand.vmem [shape: f32[32,16], index: 1, kind: input, shape index: {}]   ;;  %s414_s2 = inlined_call_operand.vmem [shape: f32[32,1], index: 2, kind: input, shape index: {}]   ;;  %s415_s3 = inlined_call_operand.vmem [shape: f32[32,1], index: 3, kind: input, shape index: {}]   ;;  %s416_s4 = inlined_call_operand.vmem [shape: f32[32,32], index: 4, kind: output, shape index: {0}]   ;;  %s417_s5 = inlined_call_operand.vmem [shape: f32[32,32], index: 5, kind: output, shape index: {1}]   ;;  %s418_s6 = inlined_call_operand.vmem [shape: f32[32,32], index: 6, kind: output, shape index: {2}]  }
   0x1   :  { %v24_v0 = vld [vmem:[%s412_s0] sm:$0xff]  ;;  %v25_v1 = vld [vmem:[%s412_s0 + $0x8] sm:$0xff]  ;;  %265 = vset.pattern.permute.xlu1 %v282_v3  ;;  %264 = vset.pattern.permute.xlu0 %v282_v3  ;;  %v22_v5 = vld [vmem:[%s413_s1 + $0x10] sm:$0xff] }
   0x2   :  { %v20_v2 = vld [vmem:[%s413_s1] sm:$0xff]  ;;  %v257_v4 = vpack.c.bf16 %v25_v1, %v24_v0  ;;  %254 = vmatprep.mubr.msk.f32.mxu1 %vm26_vm0, %v22_v5  ;;  %v131_v6 = vld [vmem:[%s414_s2 + $0x10] sm:$0xff]  ;;  %v21_v8 = vld [vmem:[%s413_s1 + $0x8] sm:$0xff] }
   0x3   :  { %251 = vmatprep.mubr.msk.f32.mxu0 %vm26_vm0, %v20_v2  ;;  %v129_v7 = vld [vmem:[%s414_s2] sm:$0xff]  ;;  %v23_v9 = vld [vmem:[%s413_s1 + $0x18] sm:$0xff]  ;;  %145 = vperm.xlu1 %265, %v131_v6   ;;  %v130_v11 = vld [vmem:[%s414_s2 + $0x8] sm:$0xff] }
   0x4   :  { %258 = vmatprep.subr.bf16.mxu0 %v257_v4  ;;  %261 = vmatprep.subr.bf16.mxu1 %v257_v4  ;;  %v132_v10 = vld [vmem:[%s414_s2 + $0x18] sm:$0xff]  ;;  %v158_v12 = vld [vmem:[%s415_s3 + $0x8] sm:$0xff]  ;;  %v157_v13 = vld [vmem:[%s415_s3] sm:$0xff] }
   0x5   :  { %260 = vmatpush3.bf16.msra.mxu0 %v257_v4  ;;  %262 = vmatpush3.bf16.msra.mxu1 %v257_v4  ;;  %v160_v14 = vld [vmem:[%s415_s3 + $0x18] sm:$0xff]  ;;  %v159_v15 = vld [vmem:[%s415_s3 + $0x10] sm:$0xff] }
   0x6   :  { %135 = vperm.xlu0 %264, %v129_v7  }
   0x7   :  { %150 = vperm.xlu1 %265, %v132_v10  }
   0x8   :  { %252 = vmatmul.mubr.msk.f32.vlgmr.msra.gmra.mrb[0].mxu0 %vm26_vm0, %v21_v8  ;;  %255 = vmatmul.mubr.msk.f32.vlgmr.msra.gmra.mrb[0].mxu1 %vm26_vm0, %v23_v9 }
   0xa   :  { %140 = vperm.xlu0 %264, %v130_v11  }
   0xb   :  { %168 = vperm.xlu1 %265, %v158_v12  }
   0xe   :  { %163 = vperm.xlu0 %264, %v157_v13  }
   0xf   :  { %178 = vperm.xlu1 %265, %v160_v14  }
  0x12   :  { %173 = vperm.xlu0 %264, %v159_v15  }
  0x82   :  { %v146_v16 = vpop.permute.xlu1 %145 }
  0x85   :  { %v136_v17 = vpop.permute.xlu0 %135 }
  0x86   :  { %v151_v18 = vpop.permute.xlu1 %150 }
  0x89   :  { %v141_v19 = vpop.permute.xlu0 %140 }
  0x8a   :  { %v169_v20 = vpop.permute.xlu1 %168 }
  0x8d   :  { %v164_v21 = vpop.permute.xlu0 %163 }
  0x8e   :  { %v179_v28 = vpop.permute.xlu1 %178 }
  0x91   :  { %v174_v31 = vpop.permute.xlu0 %173 }
  0xdb   :  { %v253_v22 = vpop.f32.mrb[0].mxu0  ;;  %v256_v23 = vpop.f32.mrb[0].mxu1 }
  0xdc   :  { %126 = vst.msk [vmem:[%s416_s4 + $0x8] sm:$0xff] %vm124_vm1, %v253_v22  ;;  %v154_v24 = vmul.f32 %v253_v22, %v141_v19  ;;  %128 = vst.msk [vmem:[%s416_s4 + $0x18] sm:$0xff] %vm124_vm1, %v256_v23  ;;  %v156_v25 = vmul.f32 %v256_v23, %v151_v18  ;;  %v105_v26 = vpop.f32.mrb[1].mxu0  ;;  %v115_v27 = vpop.f32.mrb[1].mxu1 }
  0xdd   :  { %125 = vst.msk [vmem:[%s416_s4] sm:$0xff] %vm124_vm1, %v105_v26  ;;  %v153_v29 = vmul.f32 %v136_v17, %v105_v26  ;;  %127 = vst.msk [vmem:[%s416_s4 + $0x10] sm:$0xff] %vm124_vm1, %v115_v27  ;;  %v155_v30 = vmul.f32 %v146_v16, %v115_v27 }
  0xde   :  { %v182_v32 = vadd.f32 %v169_v20, %v154_v24  ;;  %v184_v33 = vadd.f32 %v179_v28, %v156_v25 }
  0xdf   :  { %v181_v34 = vadd.f32 %v164_v21, %v153_v29  ;;  %v183_v35 = vadd.f32 %v174_v31, %v155_v30 }
  0xe0   :  { %186 = vst.msk [vmem:[%s417_s5 + $0x8] sm:$0xff] %vm124_vm1, %v182_v32  ;;  %v238_v36 = vmul.f32 -1.442695, %v182_v32  ;;  %188 = vst.msk [vmem:[%s417_s5 + $0x18] sm:$0xff] %vm124_vm1, %v184_v33  ;;  %v240_v37 = vmul.f32 -1.442695, %v184_v33 }
  0xe1   :  { %185 = vst.msk [vmem:[%s417_s5] sm:$0xff] %vm124_vm1, %v181_v34  ;;  %v237_v38 = vmul.f32 -1.442695, %v181_v34  ;;  %187 = vst.msk [vmem:[%s417_s5 + $0x10] sm:$0xff] %vm124_vm1, %v183_v35  ;;  %v239_v39 = vmul.f32 -1.442695, %v183_v35 }
  0xe2   :  { %266 = vpow2.f32 %v238_v36 }
  0xe3   :  { %268 = vpow2.f32 %v240_v37 }
  0xe4   :  { %270 = vpow2.f32 %v237_v38 }
  0xe5   :  { %272 = vpow2.f32 %v239_v39 }
  0xec   :  { %v267_v40 = vpop.eup %266 }
  0xed   :  { %v269_v41 = vpop.eup %268  ;;  %v202_v42 = vadd.f32 1.0, %v267_v40 }
  0xee   :  { %v271_v43 = vpop.eup %270  ;;  %v204_v44 = vadd.f32 1.0, %v269_v41 }
  0xef   :  { %v273_v45 = vpop.eup %272  ;;  %274 = vrcp.f32 %v202_v42  ;;  %v201_v46 = vadd.f32 1.0, %v271_v43 }
  0xf0   :  { %276 = vrcp.f32 %v204_v44  ;;  %v203_v47 = vadd.f32 1.0, %v273_v45 }
  0xf1   :  { %278 = vrcp.f32 %v201_v46 }
  0xf2   :  { %280 = vrcp.f32 %v203_v47 }
  0xf9   :  { %v275_v48 = vpop.eup %274 }
  0xfa   :  { %v277_v49 = vpop.eup %276  ;;  %v214_v50 = vmul.f32 %v275_v48, %v182_v32 }
  0xfb   :  { %v279_v51 = vpop.eup %278  ;;  %v216_v52 = vmul.f32 %v277_v49, %v184_v33 }
  0xfc   :  { %v281_v53 = vpop.eup %280  ;;  %218 = vst.msk [vmem:[%s418_s6 + $0x8] sm:$0xff] %vm124_vm1, %v214_v50  ;;  %v213_v54 = vmul.f32 %v279_v51, %v181_v34 }
  0xfd   :  { %220 = vst.msk [vmem:[%s418_s6 + $0x18] sm:$0xff] %vm124_vm1, %v216_v52  ;;  %v215_v55 = vmul.f32 %v281_v53, %v183_v35 }
  0xfe   :  { %217 = vst.msk [vmem:[%s418_s6] sm:$0xff] %vm124_vm1, %v213_v54 }
  0xff   :  { %219 = vst.msk [vmem:[%s418_s6 + $0x10] sm:$0xff] %vm124_vm1, %v215_v55 }

</bundles_post_ra>
